<compile_context>
chip_gen: v5e
topology: v5e:2x2
jax: 0.10.0
libtpu: 0.0.40
codegen_flags: <defaults>
</compile_context>

<pallas_src>
import functools
import math

import jax
import jax.numpy as jnp
from jax.experimental import pallas as pl
from jax.experimental.pallas import tpu as pltpu

H_NEURONS_L1 = 128
H_NEURONS_L2 = 64
F_PAD = 128               # uniform padded (lane-dense) feature width
FUSED_MAX_NODES = 1024    # beyond this, switch to the tiled path


# ---------------------------------------------------------------------------
# Fused kernel: whole problem resident in VMEM (small graphs only).
# ---------------------------------------------------------------------------
def gcn_fused_kernel(x_ref, adj_ref, w_ref, b_ref, out_ref):
    adj = adj_ref[...]                                        # [N, N] bf16

    # gc1 + ReLU
    h = jnp.dot(x_ref[...], w_ref[0], preferred_element_type=jnp.float32)
    h = jnp.dot(adj, h.astype(jnp.bfloat16),
                preferred_element_type=jnp.float32) + b_ref[0]
    h = jnp.maximum(h, 0.0)
    # TODO(synk): training-mode dropout would use pltpu.prng_seed +
    # pltpu.prng_random_bits for an in-kernel mask; eval mode is identity.

    # gc2 + ReLU
    h = jnp.dot(h.astype(jnp.bfloat16), w_ref[1],
                preferred_element_type=jnp.float32)
    h = jnp.dot(adj, h.astype(jnp.bfloat16),
                preferred_element_type=jnp.float32) + b_ref[1]
    h = jnp.maximum(h, 0.0)

    # gc3 (no activation), lane-dense padded output slab
    h = jnp.dot(h.astype(jnp.bfloat16), w_ref[2],
                preferred_element_type=jnp.float32)
    out_ref[...] = jnp.dot(adj, h.astype(jnp.bfloat16),
                           preferred_element_type=jnp.float32) + b_ref[2]


# ---------------------------------------------------------------------------
# Tiled per-layer kernel: one row block of the output per grid-i, K-loop over
# adjacency column blocks with an f32 VMEM accumulator.
# Uses (adj @ h) @ W (associativity) so each row block only does its own work.
# ---------------------------------------------------------------------------
def gc_layer_kernel(adj_ref, h_ref, w_ref, b_ref, out_ref, acc_ref, *,
                    apply_relu):
    k = pl.program_id(1)

    @pl.when(k == 0)
    def _():
        acc_ref[...] = jnp.zeros_like(acc_ref)

    acc_ref[...] += jnp.dot(adj_ref[...], h_ref[...],
                            preferred_element_type=jnp.float32)

    @pl.when(k == pl.num_programs(1) - 1)
    def _():
        out = jnp.dot(acc_ref[...].astype(jnp.bfloat16), w_ref[...],
                      preferred_element_type=jnp.float32) + b_ref[...]
        if apply_relu:
            out = jnp.maximum(out, 0.0)
        out_ref[...] = out.astype(out_ref.dtype)


# ---------------------------------------------------------------------------
# Wrappers
# ---------------------------------------------------------------------------
def _prepare_padded_params(params):
    """Zero-pad every layer to F_PAD x F_PAD and pack into single buffers.

    W2's padded columns + zero b2 make the padded h2 columns exactly 0, and
    W3's padded rows are 0, so padding never changes the real outputs.
    """
    (w1, b1), (w2, b2), (w3, b3) = params
    out_c = w3.shape[1]
    assert max(w1.shape[0], w2.shape[1], w3.shape[0], out_c) <= F_PAD

    def pad_w(w):
        return jnp.zeros((F_PAD, F_PAD), jnp.float32).at[
            :w.shape[0], :w.shape[1]].set(w)

    def pad_b(b):
        return jnp.zeros((1, F_PAD), jnp.float32).at[:, :b.shape[1]].set(b)

    w_packed = jnp.stack([pad_w(w1), pad_w(w2), pad_w(w3)]).astype(jnp.bfloat16)
    b_packed = jnp.stack([pad_b(b1), pad_b(b2), pad_b(b3)])   # f32
    return w_packed, b_packed, out_c


def _gcn_fused(x, adj, w_packed, b_packed):
    n, in_c = x.shape
    xp = jnp.zeros((n, F_PAD), jnp.bfloat16).at[:, :in_c].set(
        x.astype(jnp.bfloat16))
    vmem = pl.BlockSpec(memory_space=pltpu.MemorySpace.VMEM)
    return pl.pallas_call(
        gcn_fused_kernel,
        out_shape=jax.ShapeDtypeStruct((n, F_PAD), jnp.float32),
        in_specs=[vmem] * 4,
        out_specs=vmem,
        compiler_params=pltpu.CompilerParams(
            vmem_limit_bytes=32 * 1024 * 1024),
    )(xp, adj.astype(jnp.bfloat16), w_packed, b_packed)


def _gc_layer_tiled(adj_b16, h_b16, w_b16, b_f32, *, apply_relu, out_dtype,
                    tm, tk):
    n = adj_b16.shape[0]
    f_in = h_b16.shape[1]
    f_out = w_b16.shape[1]
    kernel = functools.partial(gc_layer_kernel, apply_relu=apply_relu)
    return pl.pallas_call(
        kernel,
        out_shape=jax.ShapeDtypeStruct((n, f_out), out_dtype),
        grid_spec=pltpu.PrefetchScalarGridSpec(
            num_scalar_prefetch=0,
            grid=(n // tm, n // tk),
            in_specs=[
                pl.BlockSpec((tm, tk), lambda i, k: (i, k)),       # adj tile
                pl.BlockSpec((tk, f_in), lambda i, k: (k, 0)),     # feature tile
                pl.BlockSpec((f_in, f_out), lambda i, k: (0, 0)),  # weight
                pl.BlockSpec((1, f_out), lambda i, k: (0, 0)),     # bias
            ],
            out_specs=pl.BlockSpec((tm, f_out), lambda i, k: (i, 0)),
            scratch_shapes=[pltpu.VMEM((tm, f_in), jnp.float32)],
        ),
        compiler_params=pltpu.CompilerParams(
            dimension_semantics=("parallel", "arbitrary")),
    )(adj_b16, h_b16, w_b16, b_f32)


def _gcn_tiled(x, adj, w_packed, b_packed):
    n, in_c = x.shape
    n_pad = ((n + 127) // 128) * 128          # (8,128)-friendly node count
    xp = jnp.zeros((n_pad, F_PAD), jnp.bfloat16).at[:n, :in_c].set(
        x.astype(jnp.bfloat16))
    adj_p = jnp.zeros((n_pad, n_pad), jnp.bfloat16).at[:n, :n].set(
        adj.astype(jnp.bfloat16))

    tm = 256 if n_pad % 256 == 0 else 128     # >=256 rows/push on v6e/v7x MXU
    tk = next(t for t in (512, 256, 128) if n_pad % t == 0)

    h = _gc_layer_tiled(adj_p, xp, w_packed[0], b_packed[0],
                        apply_relu=True, out_dtype=jnp.bfloat16, tm=tm, tk=tk)
    h = _gc_layer_tiled(adj_p, h, w_packed[1], b_packed[1],
                        apply_relu=True, out_dtype=jnp.bfloat16, tm=tm, tk=tk)
    out = _gc_layer_tiled(adj_p, h, w_packed[2], b_packed[2],
                          apply_relu=False, out_dtype=jnp.float32, tm=tm, tk=tk)
    return out[:n]


def gcn_forward(x, adj, params, *, fused_max_nodes=FUSED_MAX_NODES):
    """x: [N, in_c] f32, adj: [N, N] f32 dense normalized adjacency."""
    n = x.shape[0]
    w_packed, b_packed, out_c = _prepare_padded_params(params)
    if n <= fused_max_nodes:
        out_padded = _gcn_fused(x, adj, w_packed, b_packed)
    else:
        out_padded = _gcn_tiled(x, adj, w_packed, b_packed)
    return out_padded[:, :out_c]


# ---------------------------------------------------------------------------
# Init + pure-JAX reference
# ---------------------------------------------------------------------------
def init_gc_params(key, in_f, out_f):
    """Kipf GraphConvolution init: U(-stdv, stdv), stdv = 1/sqrt(out_f)."""
    kw, kb = jax.random.split(key)
    stdv = 1.0 / math.sqrt(out_f)
    w = jax.random.uniform(kw, (in_f, out_f), jnp.float32, -stdv, stdv)
    b = jax.random.uniform(kb, (1, out_f), jnp.float32, -stdv, stdv)
    return w, b


def reference_forward(x, adj, params):
    (w1, b1), (w2, b2), (w3, b3) = params
    h = jnp.maximum(adj @ (x @ w1) + b1, 0.0)
    h = jnp.maximum(adj @ (h @ w2) + b2, 0.0)
    return adj @ (h @ w3) + b3


def _make_adj(key, n):
    a = (jax.random.uniform(key, (n, n)) < 0.05).astype(jnp.float32)
    a = jnp.maximum(a, a.T) + jnp.eye(n, dtype=jnp.float32)
    return a / jnp.sum(a, axis=1, keepdims=True)


if __name__ == "__main__":
    key = jax.random.PRNGKey(0)
    k_x, k_adj, k1, k2, k3, k_x2, k_adj2 = jax.random.split(key, 7)

    N, IN_C, OUT_C = 128, 32, 16
    x = jax.random.normal(k_x, (N, IN_C), jnp.float32)
    adj = _make_adj(k_adj, N)

    params = (
        init_gc_params(k1, IN_C, H_NEURONS_L1),
        init_gc_params(k2, H_NEURONS_L1, H_NEURONS_L2),
        init_gc_params(k3, H_NEURONS_L2, OUT_C),
    )

    # Small graph -> fused single-block kernel.
    out = jax.block_until_ready(gcn_forward(x, adj, params))
    ref = reference_forward(x, adj, params)
    assert out.shape == (N, OUT_C)
    assert jnp.allclose(out, ref, atol=3e-2, rtol=3e-2), float(
        jnp.max(jnp.abs(out - ref)))

    # Exercise the scalable row-tiled / K-looped path (forced via gate=0),
    # including node-count padding (300 -> 384) and multi-step accumulation.
    N2 = 300
    x2 = jax.random.normal(k_x2, (N2, IN_C), jnp.float32)
    adj2 = _make_adj(k_adj2, N2)
    out2 = jax.block_until_ready(
        gcn_forward(x2, adj2, params, fused_max_nodes=0))
    ref2 = reference_forward(x2, adj2, params)
    assert out2.shape == (N2, OUT_C)
    assert jnp.allclose(out2, ref2, atol=3e-2, rtol=3e-2), float(
        jnp.max(jnp.abs(out2 - ref2)))

    print("KERNEL_OK")
</pallas_src>

<mosaic_0001>
module attributes {stable_mosaic.version = 11 : i64} {
  func.func @gcn_fused_kernel(%arg0: memref<128x128xbf16, #tpu.memory_space<vmem>>, %arg1: memref<128x128xbf16, #tpu.memory_space<vmem>>, %arg2: memref<3x128x128xbf16, #tpu.memory_space<vmem>>, %arg3: memref<3x1x128xf32, #tpu.memory_space<vmem>>, %arg4: memref<128x128xf32, #tpu.memory_space<vmem>>) attributes {dimension_semantics = [], scalar_prefetch = 0 : i64, scratch_operands = 0 : i64, tpu.core_type = #tpu.core_type<tc>} {
    %c0 = arith.constant 0 : index
    %c0_0 = arith.constant 0 : index
    %0 = vector.load %arg1[%c0, %c0_0] : memref<128x128xbf16, #tpu.memory_space<vmem>>, vector<128x128xbf16>
    %c0_1 = arith.constant 0 : index
    %c0_2 = arith.constant 0 : index
    %1 = vector.load %arg0[%c0_1, %c0_2] : memref<128x128xbf16, #tpu.memory_space<vmem>>, vector<128x128xbf16>
    %c0_3 = arith.constant 0 : index
    %c0_4 = arith.constant 0 : index
    %c0_5 = arith.constant 0 : index
    %2 = vector.load %arg2[%c0_3, %c0_4, %c0_5] : memref<3x128x128xbf16, #tpu.memory_space<vmem>>, vector<1x128x128xbf16>
    %3 = vector.shape_cast %2 : vector<1x128x128xbf16> to vector<128x128xbf16>
    %cst = arith.constant dense<0.000000e+00> : vector<128x128xf32>
    %4 = tpu.matmul %1, %3, %cst {dimension_numbers = #tpu.dot_dimension_numbers<[1], [0], [0], [1], [0, 0, 1, 1], [], []>} : vector<128x128xbf16>, vector<128x128xbf16>, vector<128x128xf32> -> vector<128x128xf32>
    %5 = arith.truncf %4 : vector<128x128xf32> to vector<128x128xbf16>
    %cst_6 = arith.constant dense<0.000000e+00> : vector<128x128xf32>
    %6 = tpu.matmul %0, %5, %cst_6 {dimension_numbers = #tpu.dot_dimension_numbers<[1], [0], [0], [1], [0, 0, 1, 1], [], []>} : vector<128x128xbf16>, vector<128x128xbf16>, vector<128x128xf32> -> vector<128x128xf32>
    %c0_7 = arith.constant 0 : index
    %c0_8 = arith.constant 0 : index
    %c0_9 = arith.constant 0 : index
    %7 = vector.load %arg3[%c0_7, %c0_8, %c0_9] : memref<3x1x128xf32, #tpu.memory_space<vmem>>, vector<1x1x128xf32>
    %8 = vector.shape_cast %7 : vector<1x1x128xf32> to vector<1x128xf32>
    %9 = vector.broadcast %8 : vector<1x128xf32> to vector<128x128xf32>
    %10 = arith.addf %6, %9 : vector<128x128xf32>
    %cst_10 = arith.constant 0.000000e+00 : f32
    %11 = vector.broadcast %cst_10 : f32 to vector<128x128xf32>
    %12 = arith.maximumf %10, %11 : vector<128x128xf32>
    %13 = arith.truncf %12 : vector<128x128xf32> to vector<128x128xbf16>
    %c1 = arith.constant 1 : index
    %c0_11 = arith.constant 0 : index
    %c0_12 = arith.constant 0 : index
    %14 = vector.load %arg2[%c1, %c0_11, %c0_12] : memref<3x128x128xbf16, #tpu.memory_space<vmem>>, vector<1x128x128xbf16>
    %15 = vector.shape_cast %14 : vector<1x128x128xbf16> to vector<128x128xbf16>
    %cst_13 = arith.constant dense<0.000000e+00> : vector<128x128xf32>
    %16 = tpu.matmul %13, %15, %cst_13 {dimension_numbers = #tpu.dot_dimension_numbers<[1], [0], [0], [1], [0, 0, 1, 1], [], []>} : vector<128x128xbf16>, vector<128x128xbf16>, vector<128x128xf32> -> vector<128x128xf32>
    %17 = arith.truncf %16 : vector<128x128xf32> to vector<128x128xbf16>
    %cst_14 = arith.constant dense<0.000000e+00> : vector<128x128xf32>
    %18 = tpu.matmul %0, %17, %cst_14 {dimension_numbers = #tpu.dot_dimension_numbers<[1], [0], [0], [1], [0, 0, 1, 1], [], []>} : vector<128x128xbf16>, vector<128x128xbf16>, vector<128x128xf32> -> vector<128x128xf32>
    %c1_15 = arith.constant 1 : index
    %c0_16 = arith.constant 0 : index
    %c0_17 = arith.constant 0 : index
    %19 = vector.load %arg3[%c1_15, %c0_16, %c0_17] : memref<3x1x128xf32, #tpu.memory_space<vmem>>, vector<1x1x128xf32>
    %20 = vector.shape_cast %19 : vector<1x1x128xf32> to vector<1x128xf32>
    %21 = vector.broadcast %20 : vector<1x128xf32> to vector<128x128xf32>
    %22 = arith.addf %18, %21 : vector<128x128xf32>
    %cst_18 = arith.constant 0.000000e+00 : f32
    %23 = vector.broadcast %cst_18 : f32 to vector<128x128xf32>
    %24 = arith.maximumf %22, %23 : vector<128x128xf32>
    %25 = arith.truncf %24 : vector<128x128xf32> to vector<128x128xbf16>
    %c2 = arith.constant 2 : index
    %c0_19 = arith.constant 0 : index
    %c0_20 = arith.constant 0 : index
    %26 = vector.load %arg2[%c2, %c0_19, %c0_20] : memref<3x128x128xbf16, #tpu.memory_space<vmem>>, vector<1x128x128xbf16>
    %27 = vector.shape_cast %26 : vector<1x128x128xbf16> to vector<128x128xbf16>
    %cst_21 = arith.constant dense<0.000000e+00> : vector<128x128xf32>
    %28 = tpu.matmul %25, %27, %cst_21 {dimension_numbers = #tpu.dot_dimension_numbers<[1], [0], [0], [1], [0, 0, 1, 1], [], []>} : vector<128x128xbf16>, vector<128x128xbf16>, vector<128x128xf32> -> vector<128x128xf32>
    %29 = arith.truncf %28 : vector<128x128xf32> to vector<128x128xbf16>
    %cst_22 = arith.constant dense<0.000000e+00> : vector<128x128xf32>
    %30 = tpu.matmul %0, %29, %cst_22 {dimension_numbers = #tpu.dot_dimension_numbers<[1], [0], [0], [1], [0, 0, 1, 1], [], []>} : vector<128x128xbf16>, vector<128x128xbf16>, vector<128x128xf32> -> vector<128x128xf32>
    %c2_23 = arith.constant 2 : index
    %c0_24 = arith.constant 0 : index
    %c0_25 = arith.constant 0 : index
    %31 = vector.load %arg3[%c2_23, %c0_24, %c0_25] : memref<3x1x128xf32, #tpu.memory_space<vmem>>, vector<1x1x128xf32>
    %32 = vector.shape_cast %31 : vector<1x1x128xf32> to vector<1x128xf32>
    %33 = vector.broadcast %32 : vector<1x128xf32> to vector<128x128xf32>
    %34 = arith.addf %30, %33 : vector<128x128xf32>
    %c0_26 = arith.constant 0 : index
    %c0_27 = arith.constant 0 : index
    %35 = vector.load %arg4[%c0_26, %c0_27] : memref<128x128xf32, #tpu.memory_space<vmem>>, vector<128x128xf32>
    tpu.vector_store %arg4[%c0_26, %c0_27], %34 {strides = array<i32>} : memref<128x128xf32, #tpu.memory_space<vmem>>, vector<128x128xf32>,
    return
  }
}

</mosaic_0001>

<bundles_post_ra>
// kernel: tpu_custom_call.1
= control target key start
LH: loop header
LB: loop body
LE: loop exit
PB: predicated region body
PF: predicated region fallthrough
CT: control target
= control target key end

     0   :  { %9 = vsyncpa [#allocation3], 0  ;;  %s1269_s0 = inlined_call_operand.hbm [shape: bf16[128,128], index: 0, kind: input, shape index: {}]   ;;  %s1270_s1 = inlined_call_operand.hbm [shape: bf16[128,128], index: 1, kind: input, shape index: {}]   ;;  %s1271_s2 = inlined_call_operand.hbm [shape: bf16[3,128,128], index: 2, kind: input, shape index: {}]   ;;  %s1272_s3 = inlined_call_operand.hbm [shape: f32[3,1,128], index: 3, kind: input, shape index: {}]   ;;  %s1273_s4 = inlined_call_operand.hbm [shape: f32[128,128], index: 4, kind: output, shape index: {}]  }
   0x1   :  { %10 = vsyncpa [#allocation6], 0 }
   0x2   :  { %11 = vsyncpa [#allocation9], 0 }
   0x3   :  { %12 = vsyncpa [#allocation4], 0  ;;  %s30_s17 = sshll.u32 %s1270_s1, 4  ;;  %s1178_s18 = smov [#allocation5]   ;;  %s31_s17 = int_to_ptr.hbm [resolvable:$true] %s30_s17 }
   0x4   :  { %s32_s19 = sshll.u32 %s1178_s18, 4  ;;  %s17_s22 = sshll.u32 %s1269_s0, 4  ;;  %s33_s19 = int_to_ptr.vmem [resolvable:$true] %s32_s19  ;;  %s18_s22 = int_to_ptr.hbm [resolvable:$true] %s17_s22 }
   0x5   :  { %s1179_s23 = smov 64   ;;  %s1180_s24 = smov 4  }
   0x6   :  { %38 = dma.hbm_to_vmem [thread:$0]  %s31_s17, 1024, %s33_s19, [#allocation6], %s1179_s23, %s1179_s23, %s1180_s24  }
   0x7   :  { %s1181_s25 = smov [#allocation2]   ;;  %s43_s29 = sshll.u32 %s1271_s2, 4  ;;  %s44_s29 = int_to_ptr.hbm [resolvable:$true] %s43_s29 }
   0x8   :  { %s19_s26 = sshll.u32 %s1181_s25, 4  ;;  %s56_s5 = sshll.u32 %s1272_s3, 4  ;;  %s20_s26 = int_to_ptr.vmem [resolvable:$true] %s19_s26  ;;  %s57_s5 = int_to_ptr.hbm [resolvable:$true] %s56_s5 }
   0x9   :  { %25 = dma.hbm_to_vmem [thread:$0]  %s18_s22, 1024, %s20_s26, [#allocation3], %s1179_s23, %s1179_s23, %s1180_s24  }
   0xa   :  { %s1182_s6 = smov [#allocation7]   ;;  %s1183_s0 = smov [#allocation8]  }
   0xb   :  { %s45_s7 = sshll.u32 %s1182_s6, 4  ;;  %s58_s8 = sshll.u32 %s1183_s0, 4  ;;  %s46_s7 = int_to_ptr.vmem [resolvable:$true] %s45_s7  ;;  %s59_s8 = int_to_ptr.vmem [resolvable:$true] %s58_s8 }
   0xc   :  { %51 = dma.hbm_to_vmem [thread:$0]  %s44_s29, 3072, %s46_s7, [#allocation6], %s1179_s23, %s1179_s23, %s1180_s24  }
   0xd   :  { %s1184_s9 = smov 16   ;;  %s1185_s10 = smov 1  }
   0xe   :  { %64 = dma.hbm_to_vmem [thread:$0]  %s57_s5, 48, %s59_s8, [#allocation9], %s1184_s9, %s1184_s9, %s1185_s10  }
   0xf   :  { %1170 = dma.done.wait [#allocation3], 1024  }
  0x10   :  { %1171 = vsyncadd [#allocation3], 4294966272 }
  0x11   :  { %1172 = dma.done.wait [#allocation6], 4096  }
  0x12   :  { %1173 = vsyncadd [#allocation6], 4294963200 }
  0x13   :  { %1174 = dma.done.wait [#allocation9], 48  }
  0x14   :  { %1175 = vsyncadd [#allocation9], 4294967248  ;;  %v1003_v0 = vld [vmem:[#allocation7 + $0x38] sm:$0xff]  ;;  %v1002_v1 = vld [vmem:[#allocation7 + $0x30] sm:$0xff]  ;;  %s1186_s2 = smov [#allocation10]   ;;  %s805_s13 = sshll.u32 %s1273_s4, 4  ;;  %s806_s13 = int_to_ptr.hbm [resolvable:$true] %s805_s13 }
  0x15   :  { %1020 = vmatpush.bf16.msra.mxu2 %v1003_v0  ;;  %225 = vmatpush.bf16.msra.mxu0 %v1003_v0  ;;  %v1001_v2 = vld [vmem:[#allocation7 + $0x28] sm:$0xff]  ;;  %v1000_v3 = vld [vmem:[#allocation7 + $0x20] sm:$0xff]  ;;  %v999_v4 = vld [vmem:[#allocation7 + $0x18] sm:$0xff]  ;;  %s803_s3 = sshll.u32 %s1186_s2, 4  ;;  %s1187_s14 = smov 128   ;;  %s804_s3 = int_to_ptr.vmem [resolvable:$true] %s803_s3 }
  0x16   :  { %v998_v5 = vld [vmem:[#allocation7 + $0x10] sm:$0xff]  ;;  %v997_v6 = vld [vmem:[#allocation7 + $0x8] sm:$0xff]  ;;  %v996_v7 = vld [vmem:[#allocation7] sm:$0xff]  ;;  %s1188_s15 = smov 8  }
  0x17   :  { %v992_v8 = vld [vmem:[#allocation2 + $0x20] sm:$0xff]  ;;  %v993_v10 = vld [vmem:[#allocation2 + $0x28] sm:$0xff]  ;;  %v994_v12 = vld [vmem:[#allocation2 + $0x30] sm:$0xff] }
  0x18   :  { %v988_v9 = vld [vmem:[#allocation2] sm:$0xff]  ;;  %v989_v11 = vld [vmem:[#allocation2 + $0x8] sm:$0xff]  ;;  %v990_v13 = vld [vmem:[#allocation2 + $0x10] sm:$0xff] }
  0x19   :  { %1021 = vmatpush.bf16.msra.mxu2 %v1002_v1  ;;  %226 = vmatpush.bf16.msra.mxu0 %v1002_v1  ;;  %v995_v14 = vld [vmem:[#allocation2 + $0x38] sm:$0xff]  ;;  %v1226_v40 = vld [vmem:[#allocation5] sm:$0xff]  ;;  %v1229_v41 = vld [vmem:[#allocation5 + $0x8] sm:$0xff] }
  0x1a   :  { %v991_v15 = vld [vmem:[#allocation2 + $0x18] sm:$0xff]  ;;  %v1232_v42 = vld [vmem:[#allocation5 + $0x20] sm:$0xff]  ;;  %v1235_v43 = vld [vmem:[#allocation5 + $0x10] sm:$0xff] }
  0x1b   :  { %v1237_v44 = vld [vmem:[#allocation5 + $0x28] sm:$0xff]  ;;  %v1011_v45 = vld [vmem:[#allocation7 + $0x78] sm:$0xff]  ;;  %v1010_v46 = vld [vmem:[#allocation7 + $0x70] sm:$0xff] }
  0x1c   :  { %v1009_v47 = vld [vmem:[#allocation7 + $0x68] sm:$0xff]  ;;  %v1241_v48 = vld [vmem:[#allocation5 + $0x18] sm:$0xff]  ;;  %v1008_v49 = vld [vmem:[#allocation7 + $0x60] sm:$0xff] }
  0x1d   :  { %1022 = vmatpush.bf16.msra.mxu2 %v1001_v2  ;;  %227 = vmatpush.bf16.msra.mxu0 %v1001_v2  ;;  %v1243_v50 = vld [vmem:[#allocation5 + $0x30] sm:$0xff]  ;;  %v1247_v51 = vld [vmem:[#allocation5 + $0x38] sm:$0xff]  ;;  %v1005_v54 = vld [vmem:[#allocation7 + $0x48] sm:$0xff] }
  0x1e   :  { %v1007_v52 = vld [vmem:[#allocation7 + $0x58] sm:$0xff]  ;;  %v1006_v53 = vld [vmem:[#allocation7 + $0x50] sm:$0xff]  ;;  %v1004_v55 = vld [vmem:[#allocation7 + $0x40] sm:$0xff] }
  0x1f   :  { %v1047_v57 = vld [vmem:[#allocation8] ss:$0 sm:$0xff] }
  0x21   :  { %1023 = vmatpush.bf16.msra.mxu2 %v1000_v3  ;;  %228 = vmatpush.bf16.msra.mxu0 %v1000_v3 }
  0x25   :  { %1024 = vmatpush.bf16.msra.mxu2 %v999_v4  ;;  %229 = vmatpush.bf16.msra.mxu0 %v999_v4 }
  0x29   :  { %1025 = vmatpush.bf16.msra.mxu2 %v998_v5  ;;  %230 = vmatpush.bf16.msra.mxu0 %v998_v5 }
  0x2d   :  { %1026 = vmatpush.bf16.msra.mxu2 %v997_v6  ;;  %231 = vmatpush.bf16.msra.mxu0 %v997_v6 }
  0x31   :  { %1027 = vmatpush.bf16.msra.mxu2 %v996_v7  ;;  %232 = vmatpush.bf16.msra.mxu0 %v996_v7 }
  0x34   :  { %253 = vmatmul.bf16.vlgmr.msra.gmra.mxu2 %v992_v8  ;;  %233 = vmatmul.bf16.vlgmr.msra.gmra.mxu0 %v988_v9 }
  0x35   :  { %472 = vmatpush.bf16.msrb.mxu2 %v1011_v45 }
  0x39   :  { %473 = vmatpush.bf16.msrb.mxu2 %v1010_v46 }
  0x3d   :  { %474 = vmatpush.bf16.msrb.mxu2 %v1009_v47 }
  0x41   :  { %475 = vmatpush.bf16.msrb.mxu2 %v1008_v49 }
  0x44   :  { %258 = vmatmul.bf16.gmra.mxu2 %v993_v10  ;;  %238 = vmatmul.bf16.gmra.mxu0 %v989_v11 }
  0x45   :  { %476 = vmatpush.bf16.msrb.mxu2 %v1007_v52 }
  0x49   :  { %477 = vmatpush.bf16.msrb.mxu2 %v1006_v53 }
  0x4d   :  { %478 = vmatpush.bf16.msrb.mxu2 %v1005_v54 }
  0x51   :  { %479 = vmatpush.bf16.msrb.mxu2 %v1004_v55 }
  0x54   :  { %263 = vmatmul.bf16.gmra.mxu2 %v994_v12  ;;  %243 = vmatmul.bf16.gmra.mxu0 %v990_v13 }
  0x64   :  { %268 = vmatmul.bf16.gmra.mxu2 %v995_v14  ;;  %248 = vmatmul.bf16.gmra.mxu0 %v991_v15 }
  0xb1   :  { %v234_v17 = vpop.f32.mrf.mxu0 }
  0xb7   :  { %v254_v16 = vpop.f32.mrf.mxu2 }
  0xb9   :  { %v236_v19 = vpop.f32.mrf.mxu0 }
  0xba   :  { %v274_v39 = vpack.c.bf16 %v236_v19, %v234_v17 }
  0xbf   :  { %v256_v18 = vpop.f32.mrf.mxu2 }
  0xc0   :  { %v278_v34 = vpack.c.bf16 %v256_v18, %v254_v16 }
  0xc1   :  { %v239_v21 = vpop.f32.mrf.mxu0 }
  0xc7   :  { %v259_v20 = vpop.f32.mrf.mxu2 }
  0xc9   :  { %v241_v23 = vpop.f32.mrf.mxu0 }
  0xca   :  { %v275_v38 = vpack.c.bf16 %v241_v23, %v239_v21 }
  0xcf   :  { %v261_v22 = vpop.f32.mrf.mxu2 }
  0xd0   :  { %v279_v33 = vpack.c.bf16 %v261_v22, %v259_v20 }
  0xd1   :  { %v244_v25 = vpop.f32.mrf.mxu0 }
  0xd7   :  { %v264_v24 = vpop.f32.mrf.mxu2 }
  0xd9   :  { %v246_v28 = vpop.f32.mrf.mxu0 }
  0xda   :  { %v276_v37 = vpack.c.bf16 %v246_v28, %v244_v25 }
  0xdf   :  { %v266_v26 = vpop.f32.mrf.mxu2 }
  0xe0   :  { %v280_v32 = vpack.c.bf16 %v266_v26, %v264_v24 }
  0xe1   :  { %v249_v31 = vpop.f32.mrf.mxu0 }
  0xe7   :  { %v269_v27 = vpop.f32.mrf.mxu2 }
  0xe9   :  { %v251_v35 = vpop.f32.mrf.mxu0 }
  0xea   :  { %v277_v36 = vpack.c.bf16 %v251_v35, %v249_v31 }
  0xef   :  { %v271_v29 = vpop.f32.mrf.mxu2 }
  0xf0   :  { %v281_v30 = vpack.c.bf16 %v271_v29, %v269_v27 }
  0xf2   :  { %334 = vmatpush.bf16.msra.mxu1 %v281_v30  ;;  %1028 = vmatpush.bf16.msra.mxu3 %v281_v30 }
  0xf6   :  { %335 = vmatpush.bf16.msra.mxu1 %v280_v32  ;;  %1029 = vmatpush.bf16.msra.mxu3 %v280_v32 }
  0xfa   :  { %336 = vmatpush.bf16.msra.mxu1 %v279_v33  ;;  %1030 = vmatpush.bf16.msra.mxu3 %v279_v33 }
  0xfe   :  { %337 = vmatpush.bf16.msra.mxu1 %v278_v34  ;;  %1031 = vmatpush.bf16.msra.mxu3 %v278_v34 }
 0x102   :  { %338 = vmatpush.bf16.msra.mxu1 %v277_v36  ;;  %1032 = vmatpush.bf16.msra.mxu3 %v277_v36 }
 0x106   :  { %339 = vmatpush.bf16.msra.mxu1 %v276_v37  ;;  %1033 = vmatpush.bf16.msra.mxu3 %v276_v37 }
 0x10a   :  { %340 = vmatpush.bf16.msra.mxu1 %v275_v38  ;;  %1034 = vmatpush.bf16.msra.mxu3 %v275_v38 }
 0x10e   :  { %341 = vmatpush.bf16.msra.mxu1 %v274_v39  ;;  %1035 = vmatpush.bf16.msra.mxu3 %v274_v39 }
 0x111   :  { %342 = vmatmul.bf16.vlgmr.msra.gmra.mxu1 %v1226_v40  ;;  %362 = vmatmul.bf16.vlgmr.msra.gmra.mxu3 %v1232_v42 }
 0x121   :  { %347 = vmatmul.bf16.gmra.mxu1 %v1229_v41  ;;  %367 = vmatmul.bf16.gmra.mxu3 %v1237_v44 }
 0x131   :  { %352 = vmatmul.bf16.gmra.mxu1 %v1235_v43  ;;  %372 = vmatmul.bf16.gmra.mxu3 %v1243_v50 }
 0x141   :  { %357 = vmatmul.bf16.gmra.mxu1 %v1241_v48  ;;  %377 = vmatmul.bf16.gmra.mxu3 %v1247_v51 }
 0x18e   :  { %v343_v56 = vpop.f32.mrf.mxu1 }
 0x18f   :  { %v344_v58 = vadd.f32 %v1047_v57, %v343_v56 }
 0x191   :  { %v383_v61 = vmax.f32 %v344_v58, 0.0 }
 0x194   :  { %v363_v13 = vpop.f32.mrf.mxu3 }
 0x195   :  { %v364_v24 = vadd.f32 %v1047_v57, %v363_v13 }
 0x196   :  { %v345_v59 = vpop.f32.mrf.mxu1 }
 0x197   :  { %v346_v60 = vadd.f32 %v1047_v57, %v345_v59  ;;  %v391_v26 = vmax.f32 %v364_v24, 0.0  ;;  %v1012_v24 = vld [vmem:[#allocation7 + $0x80] sm:$0xff] }
 0x199   :  { %v384_v62 = vmax.f32 %v346_v60, 0.0 }
 0x19b   :  { %v399_v63 = vpack.c.bf16 %v384_v62, %v383_v61 }
 0x19c   :  { %v365_v16 = vpop.f32.mrf.mxu3 }
 0x19d   :  { %480 = vmatmul.bf16.vlgmr.msrb.gmra.mxu2 %v399_v63  ;;  %v366_v25 = vadd.f32 %v1047_v57, %v365_v16 }
 0x19e   :  { %v348_v0 = vpop.f32.mrf.mxu1 }
 0x19f   :  { %v349_v1 = vadd.f32 %v1047_v57, %v348_v0  ;;  %v392_v27 = vmax.f32 %v366_v25, 0.0 }
 0x1a1   :  { %v385_v4 = vmax.f32 %v349_v1, 0.0  ;;  %v403_v29 = vpack.c.bf16 %v392_v27, %v391_v26  ;;  %v1048_v26 = vld [vmem:[#allocation8 + $0x1] ss:$0 sm:$0xff] }
 0x1a4   :  { %v368_v23 = vpop.f32.mrf.mxu3 }
 0x1a5   :  { %v369_v31 = vadd.f32 %v1047_v57, %v368_v23  ;;  %v1013_v23 = vld [vmem:[#allocation7 + $0x88] sm:$0xff] }
 0x1a6   :  { %v350_v2 = vpop.f32.mrf.mxu1 }
 0x1a7   :  { %v351_v3 = vadd.f32 %v1047_v57, %v350_v2  ;;  %v393_v33 = vmax.f32 %v369_v31, 0.0 }
 0x1a9   :  { %v386_v5 = vmax.f32 %v351_v3, 0.0 }
 0x1ab   :  { %v400_v6 = vpack.c.bf16 %v386_v5, %v385_v4 }
 0x1ac   :  { %v370_v28 = vpop.f32.mrf.mxu3 }
 0x1ad   :  { %485 = vmatmul.bf16.gmra.mxu2 %v400_v6  ;;  %v371_v32 = vadd.f32 %v1047_v57, %v370_v28 }
 0x1ae   :  { %v353_v7 = vpop.f32.mrf.mxu1 }
 0x1af   :  { %v354_v8 = vadd.f32 %v1047_v57, %v353_v7  ;;  %v394_v34 = vmax.f32 %v371_v32, 0.0 }
 0x1b1   :  { %v387_v11 = vmax.f32 %v354_v8, 0.0  ;;  %v404_v35 = vpack.c.bf16 %v394_v34, %v393_v33 }
 0x1b4   :  { %v373_v30 = vpop.f32.mrf.mxu3 }
 0x1b5   :  { %v374_v37 = vadd.f32 %v1047_v57, %v373_v30 }
 0x1b6   :  { %v355_v9 = vpop.f32.mrf.mxu1 }
 0x1b7   :  { %v356_v10 = vadd.f32 %v1047_v57, %v355_v9  ;;  %v395_v45 = vmax.f32 %v374_v37, 0.0 }
 0x1b9   :  { %v388_v12 = vmax.f32 %v356_v10, 0.0 }
 0x1bb   :  { %v401_v14 = vpack.c.bf16 %v388_v12, %v387_v11 }
 0x1bc   :  { %v375_v36 = vpop.f32.mrf.mxu3 }
 0x1bd   :  { %490 = vmatmul.bf16.gmra.mxu2 %v401_v14  ;;  %v376_v38 = vadd.f32 %v1047_v57, %v375_v36 }
 0x1be   :  { %v358_v15 = vpop.f32.mrf.mxu1 }
 0x1bf   :  { %v359_v17 = vadd.f32 %v1047_v57, %v358_v15  ;;  %v396_v46 = vmax.f32 %v376_v38, 0.0 }
 0x1c1   :  { %v389_v20 = vmax.f32 %v359_v17, 0.0  ;;  %v405_v47 = vpack.c.bf16 %v396_v46, %v395_v45  ;;  %v1019_v17 = vld [vmem:[#allocation7 + $0xb8] sm:$0xff] }
 0x1c2   :  { %672 = vmatpush.bf16.msrb.mxu0 %v1019_v17 }
 0x1c4   :  { %v378_v39 = vpop.f32.mrf.mxu3 }
 0x1c5   :  { %v379_v52 = vadd.f32 %v1047_v57, %v378_v39 }
 0x1c6   :  { %v360_v18 = vpop.f32.mrf.mxu1 }
 0x1c7   :  { %v361_v19 = vadd.f32 %v1047_v57, %v360_v18  ;;  %v397_v54 = vmax.f32 %v379_v52, 0.0  ;;  %v1018_v18 = vld [vmem:[#allocation7 + $0xb0] sm:$0xff] }
 0x1c8   :  { %673 = vmatpush.bf16.msrb.mxu0 %v1018_v18 }
 0x1c9   :  { %v390_v21 = vmax.f32 %v361_v19, 0.0  ;;  %v1017_v19 = vld [vmem:[#allocation7 + $0xa8] sm:$0xff] }
 0x1cb   :  { %v402_v22 = vpack.c.bf16 %v390_v21, %v389_v20  ;;  %v1016_v20 = vld [vmem:[#allocation7 + $0xa0] sm:$0xff]  ;;  %v1015_v21 = vld [vmem:[#allocation7 + $0x98] sm:$0xff] }
 0x1cc   :  { %v380_v49 = vpop.f32.mrf.mxu3  ;;  %674 = vmatpush.bf16.msrb.mxu0 %v1017_v19 }
 0x1cd   :  { %495 = vmatmul.bf16.gmra.mxu2 %v402_v22  ;;  %v381_v53 = vadd.f32 %v1047_v57, %v380_v49  ;;  %v1014_v22 = vld [vmem:[#allocation7 + $0x90] sm:$0xff] }
 0x1cf   :  { %v398_v55 = vmax.f32 %v381_v53, 0.0 }
 0x1d0   :  { %675 = vmatpush.bf16.msrb.mxu0 %v1016_v20 }
 0x1d1   :  { %v406_v56 = vpack.c.bf16 %v398_v55, %v397_v54 }
 0x1d4   :  { %676 = vmatpush.bf16.msrb.mxu0 %v1015_v21 }
 0x1d8   :  { %677 = vmatpush.bf16.msrb.mxu0 %v1014_v22 }
 0x1dc   :  { %678 = vmatpush.bf16.msrb.mxu0 %v1013_v23 }
 0x1dd   :  { %500 = vmatmul.bf16.gmra.mxu2 %v403_v29 }
 0x1e0   :  { %679 = vmatpush.bf16.msrb.mxu0 %v1012_v24 }
 0x1ed   :  { %505 = vmatmul.bf16.gmra.mxu2 %v404_v35 }
 0x1fd   :  { %510 = vmatmul.bf16.gmra.mxu2 %v405_v47 }
 0x20d   :  { %515 = vmatmul.bf16.gmra.mxu2 %v406_v56 }
 0x220   :  { %v481_v58 = vpop.f32.mrf.mxu2 }
 0x228   :  { %v483_v59 = vpop.f32.mrf.mxu2 }
 0x229   :  { %v521_v60 = vpack.c.bf16 %v483_v59, %v481_v58 }
 0x230   :  { %v486_v61 = vpop.f32.mrf.mxu2 }
 0x238   :  { %v488_v62 = vpop.f32.mrf.mxu2 }
 0x239   :  { %v522_v63 = vpack.c.bf16 %v488_v62, %v486_v61 }
 0x240   :  { %v491_v0 = vpop.f32.mrf.mxu2 }
 0x248   :  { %v493_v1 = vpop.f32.mrf.mxu2 }
 0x249   :  { %v523_v2 = vpack.c.bf16 %v493_v1, %v491_v0 }
 0x250   :  { %v496_v3 = vpop.f32.mrf.mxu2 }
 0x258   :  { %v498_v4 = vpop.f32.mrf.mxu2 }
 0x259   :  { %v524_v5 = vpack.c.bf16 %v498_v4, %v496_v3 }
 0x260   :  { %v501_v6 = vpop.f32.mrf.mxu2 }
 0x268   :  { %v503_v7 = vpop.f32.mrf.mxu2 }
 0x269   :  { %v525_v16 = vpack.c.bf16 %v503_v7, %v501_v6 }
 0x270   :  { %v506_v8 = vpop.f32.mrf.mxu2 }
 0x278   :  { %v508_v57 = vpop.f32.mrf.mxu2 }
 0x279   :  { %v526_v15 = vpack.c.bf16 %v508_v57, %v506_v8 }
 0x280   :  { %v511_v9 = vpop.f32.mrf.mxu2 }
 0x288   :  { %v513_v10 = vpop.f32.mrf.mxu2 }
 0x289   :  { %v527_v14 = vpack.c.bf16 %v513_v10, %v511_v9 }
 0x290   :  { %v516_v11 = vpop.f32.mrf.mxu2 }
 0x298   :  { %v518_v12 = vpop.f32.mrf.mxu2 }
 0x299   :  { %v528_v13 = vpack.c.bf16 %v518_v12, %v516_v11 }
 0x29b   :  { %534 = vmatpush.bf16.msrb.mxu3 %v528_v13 }
 0x29f   :  { %535 = vmatpush.bf16.msrb.mxu3 %v527_v14 }
 0x2a3   :  { %536 = vmatpush.bf16.msrb.mxu3 %v526_v15 }
 0x2a7   :  { %537 = vmatpush.bf16.msrb.mxu3 %v525_v16 }
 0x2ab   :  { %538 = vmatpush.bf16.msrb.mxu3 %v524_v5 }
 0x2af   :  { %539 = vmatpush.bf16.msrb.mxu3 %v523_v2 }
 0x2b3   :  { %540 = vmatpush.bf16.msrb.mxu3 %v522_v63 }
 0x2b7   :  { %541 = vmatpush.bf16.msrb.mxu3 %v521_v60 }
 0x2ba   :  { %542 = vmatmul.bf16.vlgmr.msrb.gmra.mxu3 %v1226_v40 }
 0x2ca   :  { %547 = vmatmul.bf16.gmra.mxu3 %v1229_v41 }
 0x2da   :  { %552 = vmatmul.bf16.gmra.mxu3 %v1235_v43 }
 0x2ea   :  { %557 = vmatmul.bf16.gmra.mxu3 %v1241_v48 }
 0x2fa   :  { %562 = vmatmul.bf16.gmra.mxu3 %v1232_v42 }
 0x30a   :  { %567 = vmatmul.bf16.gmra.mxu3 %v1237_v44 }
 0x31a   :  { %572 = vmatmul.bf16.gmra.mxu3 %v1243_v50 }
 0x32a   :  { %577 = vmatmul.bf16.gmra.mxu3 %v1247_v51 }
 0x33d   :  { %v543_v25 = vpop.f32.mrf.mxu3 }
 0x33e   :  { %v544_v27 = vadd.f32 %v1048_v26, %v543_v25 }
 0x340   :  { %v583_v30 = vmax.f32 %v544_v27, 0.0 }
 0x345   :  { %v545_v28 = vpop.f32.mrf.mxu3 }
 0x346   :  { %v546_v29 = vadd.f32 %v1048_v26, %v545_v28 }
 0x348   :  { %v584_v31 = vmax.f32 %v546_v29, 0.0 }
 0x34a   :  { %v599_v32 = vpack.c.bf16 %v584_v31, %v583_v30 }
 0x34c   :  { %680 = vmatmul.bf16.vlgmr.msrb.gmra.mxu0 %v599_v32 }
 0x34d   :  { %v548_v33 = vpop.f32.mrf.mxu3 }
 0x34e   :  { %v549_v34 = vadd.f32 %v1048_v26, %v548_v33 }
 0x350   :  { %v585_v37 = vmax.f32 %v549_v34, 0.0 }
 0x355   :  { %v550_v35 = vpop.f32.mrf.mxu3 }
 0x356   :  { %v551_v36 = vadd.f32 %v1048_v26, %v550_v35 }
 0x358   :  { %v586_v38 = vmax.f32 %v551_v36, 0.0 }
 0x35a   :  { %v600_v39 = vpack.c.bf16 %v586_v38, %v585_v37 }
 0x35c   :  { %685 = vmatmul.bf16.gmra.mxu0 %v600_v39 }
 0x35d   :  { %v553_v45 = vpop.f32.mrf.mxu3 }
 0x35e   :  { %v554_v46 = vadd.f32 %v1048_v26, %v553_v45 }
 0x360   :  { %v587_v52 = vmax.f32 %v554_v46, 0.0 }
 0x365   :  { %v555_v47 = vpop.f32.mrf.mxu3 }
 0x366   :  { %v556_v49 = vadd.f32 %v1048_v26, %v555_v47 }
 0x368   :  { %v588_v53 = vmax.f32 %v556_v49, 0.0 }
 0x36a   :  { %v601_v54 = vpack.c.bf16 %v588_v53, %v587_v52 }
 0x36c   :  { %690 = vmatmul.bf16.gmra.mxu0 %v601_v54 }
 0x36d   :  { %v558_v55 = vpop.f32.mrf.mxu3 }
 0x36e   :  { %v559_v56 = vadd.f32 %v1048_v26, %v558_v55 }
 0x370   :  { %v589_v60 = vmax.f32 %v559_v56, 0.0 }
 0x375   :  { %v560_v58 = vpop.f32.mrf.mxu3 }
 0x376   :  { %v561_v59 = vadd.f32 %v1048_v26, %v560_v58 }
 0x378   :  { %v590_v61 = vmax.f32 %v561_v59, 0.0  ;;  %v1049_v59 = vld [vmem:[#allocation8 + $0x2] ss:$0 sm:$0xff] }
 0x37a   :  { %v602_v62 = vpack.c.bf16 %v590_v61, %v589_v60 }
 0x37c   :  { %695 = vmatmul.bf16.gmra.mxu0 %v602_v62 }
 0x37d   :  { %v563_v63 = vpop.f32.mrf.mxu3 }
 0x37e   :  { %v564_v0 = vadd.f32 %v1048_v26, %v563_v63 }
 0x380   :  { %v591_v3 = vmax.f32 %v564_v0, 0.0 }
 0x385   :  { %v565_v1 = vpop.f32.mrf.mxu3 }
 0x386   :  { %v566_v2 = vadd.f32 %v1048_v26, %v565_v1 }
 0x388   :  { %v592_v4 = vmax.f32 %v566_v2, 0.0 }
 0x38a   :  { %v603_v5 = vpack.c.bf16 %v592_v4, %v591_v3 }
 0x38c   :  { %700 = vmatmul.bf16.gmra.mxu0 %v603_v5 }
 0x38d   :  { %v568_v6 = vpop.f32.mrf.mxu3 }
 0x38e   :  { %v569_v7 = vadd.f32 %v1048_v26, %v568_v6 }
 0x390   :  { %v593_v9 = vmax.f32 %v569_v7, 0.0 }
 0x395   :  { %v570_v8 = vpop.f32.mrf.mxu3 }
 0x396   :  { %v571_v57 = vadd.f32 %v1048_v26, %v570_v8 }
 0x398   :  { %v594_v10 = vmax.f32 %v571_v57, 0.0 }
 0x39a   :  { %v604_v11 = vpack.c.bf16 %v594_v10, %v593_v9 }
 0x39c   :  { %705 = vmatmul.bf16.gmra.mxu0 %v604_v11 }
 0x39d   :  { %v573_v12 = vpop.f32.mrf.mxu3 }
 0x39e   :  { %v574_v13 = vadd.f32 %v1048_v26, %v573_v12 }
 0x3a0   :  { %v595_v16 = vmax.f32 %v574_v13, 0.0 }
 0x3a5   :  { %v575_v14 = vpop.f32.mrf.mxu3 }
 0x3a6   :  { %v576_v15 = vadd.f32 %v1048_v26, %v575_v14 }
 0x3a8   :  { %v596_v17 = vmax.f32 %v576_v15, 0.0 }
 0x3aa   :  { %v605_v18 = vpack.c.bf16 %v596_v17, %v595_v16 }
 0x3ac   :  { %710 = vmatmul.bf16.gmra.mxu0 %v605_v18 }
 0x3ad   :  { %v578_v19 = vpop.f32.mrf.mxu3 }
 0x3ae   :  { %v579_v20 = vadd.f32 %v1048_v26, %v578_v19 }
 0x3b0   :  { %v597_v23 = vmax.f32 %v579_v20, 0.0 }
 0x3b5   :  { %v580_v21 = vpop.f32.mrf.mxu3 }
 0x3b6   :  { %v581_v22 = vadd.f32 %v1048_v26, %v580_v21 }
 0x3b8   :  { %v598_v24 = vmax.f32 %v581_v22, 0.0 }
 0x3ba   :  { %v606_v25 = vpack.c.bf16 %v598_v24, %v597_v23 }
 0x3bc   :  { %715 = vmatmul.bf16.gmra.mxu0 %v606_v25 }
 0x3c9   :  { %v681_v27 = vpop.f32.mrf.mxu0 }
 0x3d1   :  { %v683_v28 = vpop.f32.mrf.mxu0 }
 0x3d2   :  { %v721_v29 = vpack.c.bf16 %v683_v28, %v681_v27 }
 0x3d9   :  { %v686_v30 = vpop.f32.mrf.mxu0 }
 0x3e1   :  { %v688_v31 = vpop.f32.mrf.mxu0 }
 0x3e2   :  { %v722_v32 = vpack.c.bf16 %v688_v31, %v686_v30 }
 0x3e9   :  { %v691_v33 = vpop.f32.mrf.mxu0 }
 0x3f1   :  { %v693_v34 = vpop.f32.mrf.mxu0 }
 0x3f2   :  { %v723_v35 = vpack.c.bf16 %v693_v34, %v691_v33 }
 0x3f9   :  { %v696_v36 = vpop.f32.mrf.mxu0 }
 0x401   :  { %v698_v37 = vpop.f32.mrf.mxu0 }
 0x402   :  { %v724_v38 = vpack.c.bf16 %v698_v37, %v696_v36 }
 0x409   :  { %v701_v39 = vpop.f32.mrf.mxu0 }
 0x411   :  { %v703_v45 = vpop.f32.mrf.mxu0 }
 0x412   :  { %v725_v58 = vpack.c.bf16 %v703_v45, %v701_v39 }
 0x419   :  { %v706_v46 = vpop.f32.mrf.mxu0 }
 0x421   :  { %v708_v26 = vpop.f32.mrf.mxu0 }
 0x422   :  { %v726_v56 = vpack.c.bf16 %v708_v26, %v706_v46 }
 0x429   :  { %v711_v47 = vpop.f32.mrf.mxu0 }
 0x431   :  { %v713_v49 = vpop.f32.mrf.mxu0 }
 0x432   :  { %v727_v55 = vpack.c.bf16 %v713_v49, %v711_v47 }
 0x439   :  { %v716_v52 = vpop.f32.mrf.mxu0 }
 0x441   :  { %v718_v53 = vpop.f32.mrf.mxu0 }
 0x442   :  { %v728_v54 = vpack.c.bf16 %v718_v53, %v716_v52 }
 0x444   :  { %734 = vmatpush.bf16.msrb.mxu1 %v728_v54 }
 0x448   :  { %735 = vmatpush.bf16.msrb.mxu1 %v727_v55 }
 0x44c   :  { %736 = vmatpush.bf16.msrb.mxu1 %v726_v56 }
 0x450   :  { %737 = vmatpush.bf16.msrb.mxu1 %v725_v58 }
 0x454   :  { %738 = vmatpush.bf16.msrb.mxu1 %v724_v38 }
 0x458   :  { %739 = vmatpush.bf16.msrb.mxu1 %v723_v35 }
 0x45c   :  { %740 = vmatpush.bf16.msrb.mxu1 %v722_v32 }
 0x460   :  { %741 = vmatpush.bf16.msrb.mxu1 %v721_v29 }
 0x463   :  { %742 = vmatmul.bf16.vlgmr.msrb.gmra.mxu1 %v1226_v40 }
 0x473   :  { %747 = vmatmul.bf16.gmra.mxu1 %v1229_v41 }
 0x483   :  { %752 = vmatmul.bf16.gmra.mxu1 %v1235_v43 }
 0x493   :  { %757 = vmatmul.bf16.gmra.mxu1 %v1241_v48 }
 0x4a3   :  { %762 = vmatmul.bf16.gmra.mxu1 %v1232_v42 }
 0x4b3   :  { %767 = vmatmul.bf16.gmra.mxu1 %v1237_v44 }
 0x4c3   :  { %772 = vmatmul.bf16.gmra.mxu1 %v1243_v50 }
 0x4d3   :  { %777 = vmatmul.bf16.gmra.mxu1 %v1247_v51 }
 0x4e0   :  { %v743_v60 = vpop.f32.mrf.mxu1 }
 0x4e1   :  { %v744_v61 = vadd.f32 %v1049_v59, %v743_v60 }
 0x4e3   :  { %783 = vst [vmem:[#allocation10] sm:$0xff] %v744_v61 }
 0x4e8   :  { %v745_v62 = vpop.f32.mrf.mxu1 }
 0x4e9   :  { %v746_v40 = vadd.f32 %v1049_v59, %v745_v62 }
 0x4eb   :  { %784 = vst [vmem:[#allocation10 + $0x8] sm:$0xff] %v746_v40 }
 0x4f0   :  { %v748_v41 = vpop.f32.mrf.mxu1 }
 0x4f1   :  { %v749_v63 = vadd.f32 %v1049_v59, %v748_v41 }
 0x4f3   :  { %785 = vst [vmem:[#allocation10 + $0x10] sm:$0xff] %v749_v63 }
 0x4f8   :  { %v750_v43 = vpop.f32.mrf.mxu1 }
 0x4f9   :  { %v751_v48 = vadd.f32 %v1049_v59, %v750_v43 }
 0x4fb   :  { %786 = vst [vmem:[#allocation10 + $0x18] sm:$0xff] %v751_v48 }
 0x500   :  { %v753_v42 = vpop.f32.mrf.mxu1 }
 0x501   :  { %v754_v0 = vadd.f32 %v1049_v59, %v753_v42 }
 0x503   :  { %787 = vst [vmem:[#allocation10 + $0x20] sm:$0xff] %v754_v0 }
 0x508   :  { %v755_v44 = vpop.f32.mrf.mxu1 }
 0x509   :  { %v756_v50 = vadd.f32 %v1049_v59, %v755_v44 }
 0x50b   :  { %788 = vst [vmem:[#allocation10 + $0x28] sm:$0xff] %v756_v50 }
 0x510   :  { %v758_v51 = vpop.f32.mrf.mxu1 }
 0x511   :  { %v759_v1 = vadd.f32 %v1049_v59, %v758_v51 }
 0x513   :  { %789 = vst [vmem:[#allocation10 + $0x30] sm:$0xff] %v759_v1 }
 0x518   :  { %v760_v2 = vpop.f32.mrf.mxu1 }
 0x519   :  { %v761_v3 = vadd.f32 %v1049_v59, %v760_v2 }
 0x51b   :  { %790 = vst [vmem:[#allocation10 + $0x38] sm:$0xff] %v761_v3 }
 0x520   :  { %v763_v4 = vpop.f32.mrf.mxu1 }
 0x521   :  { %v764_v5 = vadd.f32 %v1049_v59, %v763_v4 }
 0x523   :  { %791 = vst [vmem:[#allocation10 + $0x40] sm:$0xff] %v764_v5 }
 0x528   :  { %v765_v6 = vpop.f32.mrf.mxu1 }
 0x529   :  { %v766_v7 = vadd.f32 %v1049_v59, %v765_v6 }
 0x52b   :  { %792 = vst [vmem:[#allocation10 + $0x48] sm:$0xff] %v766_v7 }
 0x530   :  { %v768_v8 = vpop.f32.mrf.mxu1 }
 0x531   :  { %v769_v57 = vadd.f32 %v1049_v59, %v768_v8 }
 0x533   :  { %793 = vst [vmem:[#allocation10 + $0x50] sm:$0xff] %v769_v57 }
 0x538   :  { %v770_v9 = vpop.f32.mrf.mxu1 }
 0x539   :  { %v771_v10 = vadd.f32 %v1049_v59, %v770_v9 }
 0x53b   :  { %794 = vst [vmem:[#allocation10 + $0x58] sm:$0xff] %v771_v10 }
 0x540   :  { %v773_v11 = vpop.f32.mrf.mxu1 }
 0x541   :  { %v774_v12 = vadd.f32 %v1049_v59, %v773_v11 }
 0x543   :  { %795 = vst [vmem:[#allocation10 + $0x60] sm:$0xff] %v774_v12 }
 0x548   :  { %v775_v13 = vpop.f32.mrf.mxu1 }
 0x549   :  { %v776_v14 = vadd.f32 %v1049_v59, %v775_v13 }
 0x54b   :  { %796 = vst [vmem:[#allocation10 + $0x68] sm:$0xff] %v776_v14 }
 0x550   :  { %v778_v15 = vpop.f32.mrf.mxu1 }
 0x551   :  { %v779_v16 = vadd.f32 %v1049_v59, %v778_v15 }
 0x553   :  { %797 = vst [vmem:[#allocation10 + $0x70] sm:$0xff] %v779_v16 }
 0x558   :  { %v780_v17 = vpop.f32.mrf.mxu1 }
 0x559   :  { %v781_v18 = vadd.f32 %v1049_v59, %v780_v17 }
 0x55b   :  { %798 = vst [vmem:[#allocation10 + $0x78] sm:$0xff] %v781_v18 }
 0x55c   :  { %811 = dma.vmem_to_hbm [thread:$0]  %s804_s3, 2048, %s806_s13, [#allocation4], %s1187_s14, %s1187_s14, %s1188_s15  }
 0x55d   :  { %1176 = dma.done.wait [#allocation4], 2048  }
 0x55e   :  { %1177 = vsyncadd [#allocation4], 4294965248 }
 0x55f   :  { %816 = vsyncpa [#allocation3], 1 }
 0x560   :  { %817 = vsyncpa [#allocation6], 1 }
 0x561   :  { %818 = vsyncpa [#allocation9], 1 }
 0x562   :  { %819 = vsyncpa [#allocation4], 1 }

</bundles_post_ra>
